<compile_context>
chip_gen: v6e
topology: v6e:2x2x1
jax: 0.10.0
libtpu: 0.0.40
codegen_flags: <defaults>
</compile_context>

<pallas_src>
import functools

import jax
import jax.numpy as jnp
from jax.experimental import pallas as pl
from jax.experimental.pallas import tpu as pltpu


# ----------------------------------------------------------------------------
# Fused kernel factory.
#   refs = (obs, act, w0_obs, w0_act, b0,
#           [w_i, b_i] * n_hidden_rest,   # hidden layers 1..L-1: (K,N), (1,N)
#           w_out, b_out,                 # output layer: (1,K), (1,1)
#           out)
# ----------------------------------------------------------------------------
def _make_fused_mlp_q_kernel(n_hidden_rest, matmul_dtype):
    def kernel(*refs):
        obs_ref, act_ref, w0o_ref, w0a_ref, b0_ref = refs[:5]
        out_ref = refs[-1]
        rest = refs[5:-1]

        # Layer 0: cat([obs, act]) @ W0 + b0 with W0 pre-split (no concat).
        # Operands cast in-kernel; f32 MXU accumulation.
        obs = obs_ref[...].astype(matmul_dtype)
        act = act_ref[...].astype(matmul_dtype)
        h = (
            jnp.dot(obs, w0o_ref[...].astype(matmul_dtype),
                    preferred_element_type=jnp.float32)
            + jnp.dot(act, w0a_ref[...].astype(matmul_dtype),
                      preferred_element_type=jnp.float32)
            + b0_ref[...]
        )
        h = jnp.maximum(h, 0.0)  # ReLU, kept in f32 on the VPU

        # Hidden layers 1..L-1 (statically unrolled, activations stay on-chip).
        for li in range(n_hidden_rest):
            w_ref = rest[2 * li]
            b_ref = rest[2 * li + 1]
            h = jnp.dot(h.astype(matmul_dtype), w_ref[...].astype(matmul_dtype),
                        preferred_element_type=jnp.float32) + b_ref[...]
            h = jnp.maximum(h, 0.0)

        # Output layer (N=1): lane-sparse on the MXU, so use VPU mul + lane
        # reduce against the (1, K) row weight instead of a dot.
        w_out_ref, b_out_ref = rest[-2], rest[-1]
        q = jnp.sum(h * w_out_ref[...], axis=-1, keepdims=True) + b_out_ref[...]
        out_ref[...] = q.astype(out_ref.dtype)

    return kernel


# ----------------------------------------------------------------------------
# Forward pass (mirrors MLP_QFunction.forward)
# ----------------------------------------------------------------------------
def mlp_qfunction_forward(params, obs, act, *, block_b=1024,
                          matmul_dtype=jnp.float32):
    B, obs_dim = obs.shape
    act_dim = act.shape[-1]

    hidden = params["hidden"]
    n_hidden_rest = len(hidden)

    flat_inputs = [obs, act, params["w0_obs"], params["w0_act"], params["b0"]]
    for w, b in hidden:
        flat_inputs += [w, b]
    flat_inputs += [params["w_out"], params["b_out"]]

    tb = min(B, block_b)
    grid = (pl.cdiv(B, tb),)

    # Batch-tiled obs/act/out follow the grid index; weights/biases have a
    # constant index_map so they are fetched once and stay VMEM-resident.
    in_specs = [
        pl.BlockSpec((tb, obs_dim), lambda i: (i, 0)),
        pl.BlockSpec((tb, act_dim), lambda i: (i, 0)),
    ]
    in_specs += [pl.BlockSpec(a.shape, lambda i: (0, 0)) for a in flat_inputs[2:]]

    kernel = _make_fused_mlp_q_kernel(n_hidden_rest, matmul_dtype)

    q = pl.pallas_call(
        kernel,
        out_shape=jax.ShapeDtypeStruct((B, 1), jnp.float32),
        grid=grid,
        in_specs=in_specs,
        out_specs=pl.BlockSpec((tb, 1), lambda i: (i, 0)),
        compiler_params=pltpu.CompilerParams(
            dimension_semantics=("parallel",),  # megacore-shardable on v7x
        ),
    )(*flat_inputs)

    return q[:, 0]  # torch.squeeze(q, -1)


# ----------------------------------------------------------------------------
# Parameter init: PyTorch-Linear-like uniform(-1/sqrt(fan_in), 1/sqrt(fan_in)).
# Weights stored pre-transposed as (in, out); layer 0 pre-split along its
# input dim; output layer stored as a (1, K) row vector for the VPU reduce.
# ----------------------------------------------------------------------------
def init_params(key, obs_dim, act_dim, hidden_sizes, dtype=jnp.float32):
    sizes = [obs_dim + act_dim] + list(hidden_sizes) + [1]
    n_layers = len(sizes) - 1
    keys = jax.random.split(key, 2 * n_layers)

    def uinit(k, shape, fan_in):
        bound = 1.0 / jnp.sqrt(jnp.float32(fan_in))
        return jax.random.uniform(k, shape, jnp.float32, -bound, bound).astype(dtype)

    fan0 = sizes[0]
    w0 = uinit(keys[0], (fan0, sizes[1]), fan0)  # (obs+act, H1)
    params = {
        "w0_obs": w0[:obs_dim],
        "w0_act": w0[obs_dim:],
        "b0": uinit(keys[1], (1, sizes[1]), fan0),
        "hidden": [],
    }
    for li in range(1, n_layers - 1):
        fan = sizes[li]
        w = uinit(keys[2 * li], (fan, sizes[li + 1]), fan)
        b = uinit(keys[2 * li + 1], (1, sizes[li + 1]), fan)
        params["hidden"].append((w, b))
    fan = sizes[-2]
    params["w_out"] = uinit(keys[2 * (n_layers - 1)], (1, fan), fan)  # (1, K)
    params["b_out"] = uinit(keys[2 * (n_layers - 1) + 1], (1, 1), fan)
    return params


# ----------------------------------------------------------------------------
# Pure-JAX reference (correctness check)
# ----------------------------------------------------------------------------
def mlp_q_reference(params, obs, act):
    x = jnp.concatenate([obs, act], axis=-1).astype(jnp.float32)
    w0 = jnp.concatenate([params["w0_obs"], params["w0_act"]], axis=0)
    h = jnp.maximum(x @ w0.astype(jnp.float32) + params["b0"], 0.0)
    for w, b in params["hidden"]:
        h = jnp.maximum(h @ w.astype(jnp.float32) + b, 0.0)
    q = h @ params["w_out"].astype(jnp.float32).T + params["b_out"]
    return jnp.squeeze(q, -1)


if __name__ == "__main__":
    key = jax.random.PRNGKey(0)
    k_obs, k_act, k_p, k_obs2, k_act2 = jax.random.split(key, 5)

    obs_dim, act_dim = 11, 3
    hidden_sizes = (256, 256)
    params = init_params(k_p, obs_dim, act_dim, hidden_sizes)

    # --- small inference-style batch: single grid step, full blocks ---------
    B_small = 2
    obs = jax.random.normal(k_obs, (B_small, obs_dim), jnp.float32)
    act = jax.random.normal(k_act, (B_small, act_dim), jnp.float32)

    fwd_f32 = jax.jit(functools.partial(
        mlp_qfunction_forward, block_b=1024, matmul_dtype=jnp.float32))
    q = jax.block_until_ready(fwd_f32(params, obs, act))
    assert q.shape == (B_small,) and q.dtype == jnp.float32
    q_ref = mlp_q_reference(params, obs, act)
    assert jnp.allclose(q, q_ref, rtol=1e-4, atol=1e-4), (q, q_ref)

    # --- training-sized batch: batch-tiled, pipelined grid ------------------
    B_big = 1024
    obs_b = jax.random.normal(k_obs2, (B_big, obs_dim), jnp.float32)
    act_b = jax.random.normal(k_act2, (B_big, act_dim), jnp.float32)

    fwd_tiled = jax.jit(functools.partial(
        mlp_qfunction_forward, block_b=512, matmul_dtype=jnp.float32))
    q_b = jax.block_until_ready(fwd_tiled(params, obs_b, act_b))
    q_b_ref = mlp_q_reference(params, obs_b, act_b)
    assert q_b.shape == (B_big,)
    assert jnp.allclose(q_b, q_b_ref, rtol=1e-4, atol=1e-4)

    # --- bf16-operand / f32-accumulate MXU fast path (v6e/v7x) --------------
    fwd_bf16 = jax.jit(functools.partial(
        mlp_qfunction_forward, block_b=512, matmul_dtype=jnp.bfloat16))
    q_bf = jax.block_until_ready(fwd_bf16(params, obs_b, act_b))
    assert q_bf.shape == (B_big,)
    assert bool(jnp.all(jnp.isfinite(q_bf)))
    assert jnp.allclose(q_bf, q_b_ref, rtol=5e-2, atol=5e-2)

    print("KERNEL_OK")
</pallas_src>

<mosaic_0001>
module attributes {stable_mosaic.version = 11 : i64} {
  func.func @kernel(%arg0: i32, %arg1: memref<2x11xf32, #tpu.memory_space<vmem>>, %arg2: memref<2x3xf32, #tpu.memory_space<vmem>>, %arg3: memref<11x256xf32, #tpu.memory_space<vmem>>, %arg4: memref<3x256xf32, #tpu.memory_space<vmem>>, %arg5: memref<1x256xf32, #tpu.memory_space<vmem>>, %arg6: memref<256x256xf32, #tpu.memory_space<vmem>>, %arg7: memref<1x256xf32, #tpu.memory_space<vmem>>, %arg8: memref<1x256xf32, #tpu.memory_space<vmem>>, %arg9: memref<1x1xf32, #tpu.memory_space<vmem>>, %arg10: memref<2x1xf32, #tpu.memory_space<vmem>>) attributes {dimension_semantics = [#tpu.dimension_semantics<parallel>], iteration_bounds = array<i64: 1>, scalar_prefetch = 0 : i64, scratch_operands = 0 : i64, tpu.core_type = #tpu.core_type<tc>, window_params = [{transform_indices = @transform_0, window_bounds = array<i64: 2, 11>}, {transform_indices = @transform_1, window_bounds = array<i64: 2, 3>}, {pipeline_mode = #tpu.pipeline_mode<synchronous>, transform_indices = @transform_2, window_bounds = array<i64: 11, 256>}, {pipeline_mode = #tpu.pipeline_mode<synchronous>, transform_indices = @transform_3, window_bounds = array<i64: 3, 256>}, {pipeline_mode = #tpu.pipeline_mode<synchronous>, transform_indices = @transform_4, window_bounds = array<i64: 1, 256>}, {pipeline_mode = #tpu.pipeline_mode<synchronous>, transform_indices = @transform_5, window_bounds = array<i64: 256, 256>}, {pipeline_mode = #tpu.pipeline_mode<synchronous>, transform_indices = @transform_6, window_bounds = array<i64: 1, 256>}, {pipeline_mode = #tpu.pipeline_mode<synchronous>, transform_indices = @transform_7, window_bounds = array<i64: 1, 256>}, {pipeline_mode = #tpu.pipeline_mode<synchronous>, transform_indices = @transform_8, window_bounds = array<i64: 1, 1>}, {transform_indices = @transform_9, window_bounds = array<i64: 2, 1>}]} {
    %c0 = arith.constant 0 : index
    %c0_0 = arith.constant 0 : index
    %0 = vector.load %arg1[%c0, %c0_0] : memref<2x11xf32, #tpu.memory_space<vmem>>, vector<2x11xf32>
    %c0_1 = arith.constant 0 : index
    %c0_2 = arith.constant 0 : index
    %1 = vector.load %arg2[%c0_1, %c0_2] : memref<2x3xf32, #tpu.memory_space<vmem>>, vector<2x3xf32>
    %c0_3 = arith.constant 0 : index
    %c0_4 = arith.constant 0 : index
    %2 = vector.load %arg3[%c0_3, %c0_4] : memref<11x256xf32, #tpu.memory_space<vmem>>, vector<11x256xf32>
    %cst = arith.constant dense<0.000000e+00> : vector<2x256xf32>
    %3 = tpu.matmul %0, %2, %cst {dimension_numbers = #tpu.dot_dimension_numbers<[1], [0], [0], [1], [0, 0, 1, 1], [], []>} : vector<2x11xf32>, vector<11x256xf32>, vector<2x256xf32> -> vector<2x256xf32>
    %c0_5 = arith.constant 0 : index
    %c0_6 = arith.constant 0 : index
    %4 = vector.load %arg4[%c0_5, %c0_6] : memref<3x256xf32, #tpu.memory_space<vmem>>, vector<3x256xf32>
    %cst_7 = arith.constant dense<0.000000e+00> : vector<2x256xf32>
    %5 = tpu.matmul %1, %4, %cst_7 {dimension_numbers = #tpu.dot_dimension_numbers<[1], [0], [0], [1], [0, 0, 1, 1], [], []>} : vector<2x3xf32>, vector<3x256xf32>, vector<2x256xf32> -> vector<2x256xf32>
    %6 = arith.addf %3, %5 : vector<2x256xf32>
    %c0_8 = arith.constant 0 : index
    %c0_9 = arith.constant 0 : index
    %7 = vector.load %arg5[%c0_8, %c0_9] : memref<1x256xf32, #tpu.memory_space<vmem>>, vector<1x256xf32>
    %8 = vector.broadcast %7 : vector<1x256xf32> to vector<2x256xf32>
    %9 = arith.addf %6, %8 : vector<2x256xf32>
    %cst_10 = arith.constant 0.000000e+00 : f32
    %10 = vector.broadcast %cst_10 : f32 to vector<2x256xf32>
    %11 = arith.maximumf %9, %10 : vector<2x256xf32>
    %c0_11 = arith.constant 0 : index
    %c0_12 = arith.constant 0 : index
    %12 = vector.load %arg6[%c0_11, %c0_12] : memref<256x256xf32, #tpu.memory_space<vmem>>, vector<256x256xf32>
    %cst_13 = arith.constant dense<0.000000e+00> : vector<2x256xf32>
    %13 = tpu.matmul %11, %12, %cst_13 {dimension_numbers = #tpu.dot_dimension_numbers<[1], [0], [0], [1], [0, 0, 1, 1], [], []>} : vector<2x256xf32>, vector<256x256xf32>, vector<2x256xf32> -> vector<2x256xf32>
    %c0_14 = arith.constant 0 : index
    %c0_15 = arith.constant 0 : index
    %14 = vector.load %arg7[%c0_14, %c0_15] : memref<1x256xf32, #tpu.memory_space<vmem>>, vector<1x256xf32>
    %15 = vector.broadcast %14 : vector<1x256xf32> to vector<2x256xf32>
    %16 = arith.addf %13, %15 : vector<2x256xf32>
    %cst_16 = arith.constant 0.000000e+00 : f32
    %17 = vector.broadcast %cst_16 : f32 to vector<2x256xf32>
    %18 = arith.maximumf %16, %17 : vector<2x256xf32>
    %c0_17 = arith.constant 0 : index
    %c0_18 = arith.constant 0 : index
    %19 = vector.load %arg8[%c0_17, %c0_18] : memref<1x256xf32, #tpu.memory_space<vmem>>, vector<1x256xf32>
    %20 = vector.broadcast %19 : vector<1x256xf32> to vector<2x256xf32>
    %21 = arith.mulf %18, %20 : vector<2x256xf32>
    %cst_19 = arith.constant dense<0.000000e+00> : vector<2xf32>
    %22 = vector.multi_reduction <add>, %21, %cst_19 [1] : vector<2x256xf32> to vector<2xf32>
    %23 = vector.shape_cast %22 : vector<2xf32> to vector<2x1xf32>
    %c0_20 = arith.constant 0 : index
    %c0_21 = arith.constant 0 : index
    %24 = vector.load %arg9[%c0_20, %c0_21] : memref<1x1xf32, #tpu.memory_space<vmem>>, vector<1x1xf32>
    %25 = vector.broadcast %24 : vector<1x1xf32> to vector<2x1xf32>
    %26 = arith.addf %23, %25 : vector<2x1xf32>
    %c0_22 = arith.constant 0 : index
    %c0_23 = arith.constant 0 : index
    %27 = vector.load %arg10[%c0_22, %c0_23] : memref<2x1xf32, #tpu.memory_space<vmem>>, vector<2x1xf32>
    tpu.vector_store %arg10[%c0_22, %c0_23], %26 {strides = array<i32>} : memref<2x1xf32, #tpu.memory_space<vmem>>, vector<2x1xf32>,
    return
  }
  func.func @transform_0(%arg0: i32) -> (i32, i32) {
    %c0_i32 = arith.constant 0 : i32
    %c0_i32_0 = arith.constant 0 : i32
    return %arg0, %c0_i32 : i32, i32
  }
  func.func @transform_1(%arg0: i32) -> (i32, i32) {
    %c0_i32 = arith.constant 0 : i32
    %c0_i32_0 = arith.constant 0 : i32
    return %arg0, %c0_i32 : i32, i32
  }
  func.func @transform_2(%arg0: i32) -> (i32, i32) {
    %c0_i32 = arith.constant 0 : i32
    %c0_i32_0 = arith.constant 0 : i32
    %c0_i32_1 = arith.constant 0 : i32
    return %c0_i32, %c0_i32_0 : i32, i32
  }
  func.func @transform_3(%arg0: i32) -> (i32, i32) {
    %c0_i32 = arith.constant 0 : i32
    %c0_i32_0 = arith.constant 0 : i32
    %c0_i32_1 = arith.constant 0 : i32
    return %c0_i32, %c0_i32_0 : i32, i32
  }
  func.func @transform_4(%arg0: i32) -> (i32, i32) {
    %c0_i32 = arith.constant 0 : i32
    %c0_i32_0 = arith.constant 0 : i32
    %c0_i32_1 = arith.constant 0 : i32
    return %c0_i32, %c0_i32_0 : i32, i32
  }
  func.func @transform_5(%arg0: i32) -> (i32, i32) {
    %c0_i32 = arith.constant 0 : i32
    %c0_i32_0 = arith.constant 0 : i32
    %c0_i32_1 = arith.constant 0 : i32
    return %c0_i32, %c0_i32_0 : i32, i32
  }
  func.func @transform_6(%arg0: i32) -> (i32, i32) {
    %c0_i32 = arith.constant 0 : i32
    %c0_i32_0 = arith.constant 0 : i32
    %c0_i32_1 = arith.constant 0 : i32
    return %c0_i32, %c0_i32_0 : i32, i32
  }
  func.func @transform_7(%arg0: i32) -> (i32, i32) {
    %c0_i32 = arith.constant 0 : i32
    %c0_i32_0 = arith.constant 0 : i32
    %c0_i32_1 = arith.constant 0 : i32
    return %c0_i32, %c0_i32_0 : i32, i32
  }
  func.func @transform_8(%arg0: i32) -> (i32, i32) {
    %c0_i32 = arith.constant 0 : i32
    %c0_i32_0 = arith.constant 0 : i32
    %c0_i32_1 = arith.constant 0 : i32
    return %c0_i32, %c0_i32_0 : i32, i32
  }
  func.func @transform_9(%arg0: i32) -> (i32, i32) {
    %c0_i32 = arith.constant 0 : i32
    %c0_i32_0 = arith.constant 0 : i32
    return %arg0, %c0_i32 : i32, i32
  }
}

</mosaic_0001>

<bundles_post_ra>
// kernel: mlp_qfunction_forward.1
= control target key start
LH: loop header
LB: loop body
LE: loop exit
PB: predicated region body
PF: predicated region fallthrough
CT: control target
= control target key end

     0   :  { %s682_s0 = inlined_call_operand.vmem [shape: f32[2,11], index: 0, kind: input, shape index: {}]   ;;  %s683_s1 = inlined_call_operand.vmem [shape: f32[2,3], index: 1, kind: input, shape index: {}]   ;;  %s684_s2 = inlined_call_operand.hbm [shape: f32[11,256], index: 2, kind: input, shape index: {}]   ;;  %s685_s3 = inlined_call_operand.hbm [shape: f32[3,256], index: 3, kind: input, shape index: {}]   ;;  %s686_s4 = inlined_call_operand.hbm [shape: f32[1,256], index: 4, kind: input, shape index: {}]   ;;  %s687_s5 = inlined_call_operand.hbm [shape: f32[256,256], index: 5, kind: input, shape index: {}]   ;;  %s688_s6 = inlined_call_operand.hbm [shape: f32[1,256], index: 6, kind: input, shape index: {}]   ;;  %s689_s7 = inlined_call_operand.vmem [shape: f32[1,256], index: 7, kind: input, shape index: {}]   ;;  %s690_s8 = inlined_call_operand.<no memory space> [shape: f32[1,1], index: 8, kind: input, shape index: {}]   ;;  %s691_s9 = inlined_call_operand.vmem [shape: f32[2,1], index: 9, kind: output, shape index: {}]  }
   0x1   :  { %v14_v0 = vstv %s690_s8 }
   0x2   :  { %15 = vst [vmem:[#allocation2] sm:$0x1] %v14_v0 }
   0x3   :  { %16 = vsyncpa [#allocation4], 0 }
   0x4   :  { %17 = vsyncpa [#allocation6], 0 }
   0x5   :  { %18 = vsyncpa [#allocation9], 0  ;;  %s590_s11 = smov [#allocation5]  }
   0x6   :  { %s41_s12 = sshll.u32 %s590_s11, 4  ;;  %s42_s12 = int_to_ptr.vmem [resolvable:$true] %s41_s12 }
   0x7   :  { %s492_s13 = scalar_lea.vmem %s42_s12, 128  ;;  %p497_p1 = scmp.lt.s32.totalorder %s42_s12, %s42_s12 }
   0x8   :  { %p493_p0 = scmp.ne.s32.totalorder %s42_s12, %s492_s13  ;;  %p498_p2 = scmp.lt.s32.totalorder %s492_s13, %s492_s13 }
   0xa   :  { %p499_p3 = por %p498_p2, %p497_p1 }
   0xc   :  { %p500_p4 = pnand %p499_p3, %p493_p0 }
   0xe   :  { %503 = shalt.err (!%p500_p4)
}
   0xf   :  { %44 = dma.hbm_to_vmem [thread:$0]  %s685_s3, 128, %s42_s12, [#allocation6]  }
  0x10   :  { %s591_s16 = smov [#allocation8]   ;;  %s592_s17 = smov [#allocation3]  }
  0x11   :  { %s60_s8 = sshll.u32 %s591_s16, 4  ;;  %s28_s18 = sshll.u32 %s592_s17, 4  ;;  %s61_s8 = int_to_ptr.vmem [resolvable:$true] %s60_s8  ;;  %s29_s18 = int_to_ptr.vmem [resolvable:$true] %s28_s18 }
  0x12   :  { %s512_s19 = scalar_lea.vmem %s61_s8, 8192  ;;  %p517_p6 = scmp.lt.s32.totalorder %s61_s8, %s61_s8 }
  0x13   :  { %p513_p5 = scmp.ne.s32.totalorder %s61_s8, %s512_s19  ;;  %p518_p7 = scmp.lt.s32.totalorder %s512_s19, %s512_s19 }
  0x15   :  { %p519_p8 = por %p518_p7, %p517_p6 }
  0x17   :  { %p520_p9 = pnand %p519_p8, %p513_p5 }
  0x19   :  { %523 = shalt.err (!%p520_p9)
}
  0x1a   :  { %s593_s20 = smov 256   ;;  %s594_s21 = smov 16  }
  0x1b   :  { %66 = dma.hbm_to_vmem [thread:$0]  %s687_s5, 8192, %s61_s8, [#allocation9], %s593_s20, %s593_s20, %s594_s21  }
  0x1c   :  { %s532_s3 = scalar_lea.vmem %s29_s18, 512  ;;  %p537_p11 = scmp.lt.s32.totalorder %s29_s18, %s29_s18 }
  0x1d   :  { %p533_p10 = scmp.ne.s32.totalorder %s29_s18, %s532_s3  ;;  %p538_p12 = scmp.lt.s32.totalorder %s532_s3, %s532_s3 }
  0x1f   :  { %p539_p13 = por %p538_p12, %p537_p11 }
  0x21   :  { %p540_p0 = pnand %p539_p13, %p533_p10 }
  0x23   :  { %543 = shalt.err (!%p540_p0)
}
  0x24   :  { %34 = dma.hbm_to_vmem [thread:$0]  %s684_s2, 512, %s29_s18, [#allocation4], %s593_s20, %s593_s20, %s594_s21  }
  0x25   :  { %s595_s26 = smov [#allocation7]   ;;  %s596_s28 = smov [#allocation10]  }
  0x26   :  { %s51_s27 = sshll.u32 %s595_s26, 4  ;;  %s73_s29 = sshll.u32 %s596_s28, 4  ;;  %s52_s27 = int_to_ptr.vmem [resolvable:$true] %s51_s27  ;;  %s74_s29 = int_to_ptr.vmem [resolvable:$true] %s73_s29 }
  0x27   :  { %s552_s30 = scalar_lea.vmem %s52_s27, 32  ;;  %p557_p2 = scmp.lt.s32.totalorder %s52_s27, %s52_s27 }
  0x28   :  { %p553_p1 = scmp.ne.s32.totalorder %s52_s27, %s552_s30  ;;  %p558_p3 = scmp.lt.s32.totalorder %s552_s30, %s552_s30 }
  0x2a   :  { %p559_p4 = por %p558_p3, %p557_p2 }
  0x2c   :  { %p560_p5 = pnand %p559_p4, %p553_p1 }
  0x2e   :  { %563 = shalt.err (!%p560_p5)
}
  0x2f   :  { %54 = dma.hbm_to_vmem [thread:$0]  %s686_s4, 32, %s52_s27, [#allocation6]  }
  0x30   :  { %s572_s11 = scalar_lea.vmem %s74_s29, 32  ;;  %p577_p7 = scmp.lt.s32.totalorder %s74_s29, %s74_s29 }
  0x31   :  { %p573_p6 = scmp.ne.s32.totalorder %s74_s29, %s572_s11  ;;  %p578_p8 = scmp.lt.s32.totalorder %s572_s11, %s572_s11 }
  0x33   :  { %p579_p9 = por %p578_p8, %p577_p7 }
  0x35   :  { %p580_p10 = pnand %p579_p9, %p573_p6 }
  0x37   :  { %583 = shalt.err (!%p580_p10)
}
  0x38   :  { %76 = dma.hbm_to_vmem [thread:$0]  %s688_s6, 32, %s74_s29, [#allocation9]  }
  0x39   :  { %584 = dma.done.wait [#allocation4], 512  }
  0x3a   :  { %585 = vsyncadd [#allocation4], 4294966784 }
  0x3b   :  { %586 = dma.done.wait [#allocation6], 160  }
  0x3c   :  { %587 = vsyncadd [#allocation6], 4294967136 }
  0x3d   :  { %588 = dma.done.wait [#allocation9], 8224  }
  0x3e   :  { %589 = vsyncadd [#allocation9], 4294959072  ;;  %v597_v1 = vmov 0.0   ;;  %v102_v2 = vld [vmem:[#allocation5] sm:$0x77]  ;;  %vm109_vm0 = vcmask 1042432  }
  0x3f   :  { %178 = vmatprep.mubr.f32.mxu1 %v597_v1  ;;  %v104_v3 = vcombine.high %v102_v2, %v102_v2  ;;  %v97_v4 = vld [vmem:[%s683_s1] sm:$0x3]  ;;  %vm105_vm1 = vcmask 23552   ;;  %v101_v5 = vld [vmem:[#allocation3 + $0x18] sm:$0x7]  ;;  %v313_v6 = vld [vmem:[#allocation8 + $0xf8] sm:$0xff] }
  0x40   :  { %v312_v7 = vld [vmem:[#allocation8 + $0xf0] sm:$0xff]  ;;  %v100_v8 = vld [vmem:[#allocation3 + $0x10] sm:$0x7]  ;;  %358 = vmatprep.subr.mxu0 %v313_v6  ;;  %v99_v9 = vld [vmem:[#allocation3 + $0x8] sm:$0xff]  ;;  %vm185_vm2 = vcmask 89088   ;;  %vm445_vm3 = vcmask 1041408  }
  0x41   :  { %468 = vmatprep.subr.msk.mxu1 %vm109_vm0, %v104_v3  ;;  %359 = vmatpush1.msra.mxu0 %v312_v7  ;;  %v311_v10 = vld [vmem:[#allocation8 + $0xe8] sm:$0xff]  ;;  %v98_v11 = vld [vmem:[#allocation3] sm:$0xff]  ;;  %v310_v12 = vld [vmem:[#allocation8 + $0xe0] sm:$0xff]  ;;  %vm459_vm4 = vcmask 1024  }
  0x42   :  { %469 = vmatpush1.msk.msra.mxu1 %vm109_vm0, %v102_v2  ;;  %v96_v13 = vld [vmem:[%s682_s0] sm:$0x3]  ;;  %v309_v14 = vld [vmem:[#allocation8 + $0xd8] sm:$0xff]  ;;  %360 = vmatprep.subr.mxu0 %v311_v10  ;;  %v307_v16 = vld [vmem:[#allocation8 + $0xc8] sm:$0xff]  ;;  %v268_v10 = vlaneseq }
  0x43   :  { %470 = vmatmul.mubr.msk.f32.vlgmr.msra.gmra.mxu1 %vm105_vm1, %v97_v4  ;;  %471 = vmatprep.subr.msk.mxu1 %vm109_vm0, %v101_v5  ;;  %v308_v15 = vld [vmem:[#allocation8 + $0xd0] sm:$0xff]  ;;  %v306_v17 = vld [vmem:[#allocation8 + $0xc0] sm:$0xff]  ;;  %v305_v18 = vld [vmem:[#allocation8 + $0xb8] sm:$0xff] }
  0x44   :  { %472 = vmatpush1.msk.msra.mxu1 %vm109_vm0, %v100_v8  ;;  %259 = vmatprep.mubr.f32.mxu1 %v597_v1  ;;  %v304_v19 = vld [vmem:[#allocation8 + $0xb0] sm:$0xff]  ;;  %v303_v20 = vld [vmem:[#allocation8 + $0xa8] sm:$0xff]  ;;  %v302_v21 = vld [vmem:[#allocation8 + $0xa0] sm:$0xff] }
  0x45   :  { %225 = vmatprep.subr.mxu1 %v99_v9  ;;  %361 = vmatpush1.msra.mxu0 %v310_v12  ;;  %v301_v22 = vld [vmem:[#allocation8 + $0x98] sm:$0xff]  ;;  %v300_v23 = vld [vmem:[#allocation8 + $0x90] sm:$0xff]  ;;  %v299_v24 = vld [vmem:[#allocation8 + $0x88] sm:$0xff] }
  0x46   :  { %226 = vmatpush1.msra.mxu1 %v98_v11  ;;  %362 = vmatprep.subr.mxu0 %v309_v14  ;;  %v298_v25 = vld [vmem:[#allocation8 + $0x80] sm:$0xff]  ;;  %v297_v26 = vld [vmem:[#allocation8 + $0x78] sm:$0xff]  ;;  %v296_v27 = vld [vmem:[#allocation8 + $0x70] sm:$0xff]  ;;  %v269_v11 = vshrl.u32 %v268_v10, 7 }
  0x47   :  { %473 = vmatmul.mubr.msk.f32.vlgmr.msra.gmra.mxu1 %vm185_vm2, %v96_v13  ;;  %363 = vmatpush1.msra.mxu0 %v308_v15  ;;  %v295_v28 = vld [vmem:[#allocation8 + $0x68] sm:$0xff]  ;;  %v294_v29 = vld [vmem:[#allocation8 + $0x60] sm:$0xff]  ;;  %v293_v30 = vld [vmem:[#allocation8 + $0x58] sm:$0xff] }
  0x48   :  { %364 = vmatprep.subr.mxu0 %v307_v16  ;;  %v292_v31 = vld [vmem:[#allocation8 + $0x50] sm:$0xff]  ;;  %v291_v32 = vld [vmem:[#allocation8 + $0x48] sm:$0xff]  ;;  %v290_v33 = vld [vmem:[#allocation8 + $0x40] sm:$0xff]  ;;  %v270_v13 = vsub.s32 0, %v269_v11  ;;  %v274_v15 = vsub.s32 1, %v269_v11 }
  0x49   :  { %365 = vmatpush1.msra.mxu0 %v306_v17  ;;  %v289_v34 = vld [vmem:[#allocation8 + $0x38] sm:$0xff]  ;;  %v288_v35 = vld [vmem:[#allocation8 + $0x30] sm:$0xff]  ;;  %v287_v36 = vld [vmem:[#allocation8 + $0x28] sm:$0xff] }
  0x4a   :  { %366 = vmatprep.subr.mxu0 %v305_v18  ;;  %v286_v37 = vld [vmem:[#allocation8 + $0x20] sm:$0xff]  ;;  %v285_v38 = vld [vmem:[#allocation8 + $0x18] sm:$0xff]  ;;  %v284_v39 = vld [vmem:[#allocation8 + $0x10] sm:$0xff] }
  0x4b   :  { %367 = vmatpush1.msra.mxu0 %v304_v19  ;;  %v283_v40 = vld [vmem:[#allocation8 + $0x8] sm:$0xff]  ;;  %v282_v41 = vld [vmem:[#allocation8] sm:$0xff]  ;;  %v345_v42 = vld [vmem:[#allocation8 + $0x1f8] sm:$0xff] }
  0x4c   :  { %368 = vmatprep.subr.mxu0 %v303_v20  ;;  %v344_v43 = vld [vmem:[#allocation8 + $0x1f0] sm:$0xff]  ;;  %v343_v44 = vld [vmem:[#allocation8 + $0x1e8] sm:$0xff]  ;;  %v342_v45 = vld [vmem:[#allocation8 + $0x1e0] sm:$0xff] }
  0x4d   :  { %369 = vmatpush1.msra.mxu0 %v302_v21  ;;  %v341_v46 = vld [vmem:[#allocation8 + $0x1d8] sm:$0xff]  ;;  %v340_v47 = vld [vmem:[#allocation8 + $0x1d0] sm:$0xff]  ;;  %v339_v48 = vld [vmem:[#allocation8 + $0x1c8] sm:$0xff] }
  0x4e   :  { %370 = vmatprep.subr.mxu0 %v301_v22  ;;  %v338_v49 = vld [vmem:[#allocation8 + $0x1c0] sm:$0xff]  ;;  %v337_v50 = vld [vmem:[#allocation8 + $0x1b8] sm:$0xff]  ;;  %v336_v51 = vld [vmem:[#allocation8 + $0x1b0] sm:$0xff] }
  0x4f   :  { %371 = vmatpush1.msra.mxu0 %v300_v23  ;;  %v335_v52 = vld [vmem:[#allocation8 + $0x1a8] sm:$0xff]  ;;  %v334_v53 = vld [vmem:[#allocation8 + $0x1a0] sm:$0xff]  ;;  %v333_v54 = vld [vmem:[#allocation8 + $0x198] sm:$0xff] }
  0x50   :  { %372 = vmatprep.subr.mxu0 %v299_v24  ;;  %v332_v55 = vld [vmem:[#allocation8 + $0x190] sm:$0xff]  ;;  %v331_v56 = vld [vmem:[#allocation8 + $0x188] sm:$0xff]  ;;  %v330_v57 = vld [vmem:[#allocation8 + $0x180] sm:$0xff] }
  0x51   :  { %373 = vmatpush1.msra.mxu0 %v298_v25  ;;  %v329_v58 = vld [vmem:[#allocation8 + $0x178] sm:$0xff]  ;;  %v328_v59 = vld [vmem:[#allocation8 + $0x170] sm:$0xff]  ;;  %v327_v60 = vld [vmem:[#allocation8 + $0x168] sm:$0xff] }
  0x52   :  { %374 = vmatprep.subr.mxu0 %v297_v26  ;;  %v326_v61 = vld [vmem:[#allocation8 + $0x160] sm:$0xff]  ;;  %v325_v62 = vld [vmem:[#allocation8 + $0x158] sm:$0xff]  ;;  %v324_v63 = vld [vmem:[#allocation8 + $0x150] sm:$0xff] }
  0x53   :  { %375 = vmatpush1.msra.mxu0 %v296_v27  ;;  %v323_v0 = vld [vmem:[#allocation8 + $0x148] sm:$0xff]  ;;  %v322_v1 = vld [vmem:[#allocation8 + $0x140] sm:$0xff]  ;;  %v321_v2 = vld [vmem:[#allocation8 + $0x138] sm:$0xff] }
  0x54   :  { %376 = vmatprep.subr.mxu0 %v295_v28  ;;  %v320_v3 = vld [vmem:[#allocation8 + $0x130] sm:$0xff]  ;;  %v319_v4 = vld [vmem:[#allocation8 + $0x128] sm:$0xff]  ;;  %v318_v5 = vld [vmem:[#allocation8 + $0x120] sm:$0xff] }
  0x55   :  { %377 = vmatpush1.msra.mxu0 %v294_v29  ;;  %v317_v6 = vld [vmem:[#allocation8 + $0x118] sm:$0xff]  ;;  %v316_v7 = vld [vmem:[#allocation8 + $0x110] sm:$0xff]  ;;  %v315_v8 = vld [vmem:[#allocation8 + $0x108] sm:$0xff] }
  0x56   :  { %378 = vmatprep.subr.mxu0 %v293_v30  ;;  %v314_v9 = vld [vmem:[#allocation8 + $0x100] sm:$0xff]  ;;  %v266_v14 = vld [vmem:[#allocation7] sm:$0x3]  ;;  %v431_v29 = vld [vmem:[%s689_s7] sm:$0x3] }
  0x57   :  { %379 = vmatpush1.msra.mxu0 %v292_v31  ;;  %v271_v18 = vrot.slane %v266_v14, %v270_v13  ;;  %v275_v20 = vrot.slane %v266_v14, %v274_v15  ;;  %v346_v27 = vld [vmem:[#allocation10] sm:$0x3] }
  0x58   :  { %380 = vmatprep.subr.mxu0 %v291_v32  ;;  %v351_v28 = vrot.slane %v346_v27, %v270_v13  ;;  %v355_v30 = vrot.slane %v346_v27, %v274_v15 }
  0x59   :  { %381 = vmatpush1.msra.mxu0 %v290_v33  ;;  %v436_v33 = vrot.slane %v431_v29, %v270_v13 }
  0x5a   :  { %382 = vmatprep.subr.mxu0 %v289_v34 }
  0x5b   :  { %383 = vmatpush1.msra.mxu0 %v288_v35 }
  0x5c   :  { %384 = vmatprep.subr.mxu0 %v287_v36 }
  0x5d   :  { %385 = vmatpush1.msra.mxu0 %v286_v37  ;;  %v440_v37 = vrot.slane %v431_v29, %v274_v15 }
  0x5e   :  { %386 = vmatprep.subr.mxu0 %v285_v38 }
  0x5f   :  { %387 = vmatpush1.msra.mxu0 %v284_v39 }
  0x60   :  { %388 = vmatprep.subr.mxu0 %v283_v40 }
  0x61   :  { %389 = vmatpush1.msra.mxu0 %v282_v41 }
  0x62   :  { %390 = vmatprep.subr.mxu0 %v345_v42 }
  0x63   :  { %391 = vmatpush2.msra.mxu0 %v344_v43 }
  0x64   :  { %392 = vmatprep.subr.mxu0 %v343_v44  ;;  %v474_v44 = vld [vmem:[#allocation2] ss:$0 sm:$0xff] }
  0x65   :  { %393 = vmatpush2.msra.mxu0 %v342_v45 }
  0x66   :  { %394 = vmatprep.subr.mxu0 %v341_v46 }
  0x67   :  { %395 = vmatpush2.msra.mxu0 %v340_v47 }
  0x68   :  { %396 = vmatprep.subr.mxu0 %v339_v48 }
  0x69   :  { %397 = vmatpush2.msra.mxu0 %v338_v49 }
  0x6a   :  { %398 = vmatprep.subr.mxu0 %v337_v50 }
  0x6b   :  { %399 = vmatpush2.msra.mxu0 %v336_v51 }
  0x6c   :  { %400 = vmatprep.subr.mxu0 %v335_v52 }
  0x6d   :  { %401 = vmatpush2.msra.mxu0 %v334_v53 }
  0x6e   :  { %402 = vmatprep.subr.mxu0 %v333_v54 }
  0x6f   :  { %403 = vmatpush2.msra.mxu0 %v332_v55 }
  0x70   :  { %404 = vmatprep.subr.mxu0 %v331_v56 }
  0x71   :  { %405 = vmatpush2.msra.mxu0 %v330_v57 }
  0x72   :  { %406 = vmatprep.subr.mxu0 %v329_v58 }
  0x73   :  { %407 = vmatpush2.msra.mxu0 %v328_v59 }
  0x74   :  { %408 = vmatprep.subr.mxu0 %v327_v60 }
  0x75   :  { %409 = vmatpush2.msra.mxu0 %v326_v61 }
  0x76   :  { %410 = vmatprep.subr.mxu0 %v325_v62 }
  0x77   :  { %411 = vmatpush2.msra.mxu0 %v324_v63 }
  0x78   :  { %412 = vmatprep.subr.mxu0 %v323_v0 }
  0x79   :  { %413 = vmatpush2.msra.mxu0 %v322_v1 }
  0x7a   :  { %414 = vmatprep.subr.mxu0 %v321_v2 }
  0x7b   :  { %415 = vmatpush2.msra.mxu0 %v320_v3 }
  0x7c   :  { %416 = vmatprep.subr.mxu0 %v319_v4 }
  0x7d   :  { %417 = vmatpush2.msra.mxu0 %v318_v5 }
  0x7e   :  { %418 = vmatprep.subr.mxu0 %v317_v6 }
  0x7f   :  { %419 = vmatpush2.msra.mxu0 %v316_v7 }
  0x80   :  { %420 = vmatprep.subr.mxu0 %v315_v8 }
  0x81   :  { %421 = vmatpush2.msra.mxu0 %v314_v9 }
 0x103   :  { %v180_v12 = vpop.f32.mrf.mxu1 }
 0x105   :  { %v182_v16 = vpop.f32.mrf.mxu1 }
 0x107   :  { %v261_v17 = vpop.f32.mrf.mxu1 }
 0x108   :  { %v262_v19 = vadd.f32 %v261_v17, %v180_v12 }
 0x109   :  { %v263_v21 = vpop.f32.mrf.mxu1 }
 0x10a   :  { %v264_v22 = vadd.f32 %v263_v21, %v182_v16  ;;  %v278_v23 = vadd.f32 %v271_v18, %v262_v19 }
 0x10c   :  { %v279_v24 = vadd.f32 %v275_v20, %v264_v22  ;;  %v280_v26 = vmax.f32 %v278_v23, 0.0 }
 0x10e   :  { %v281_v25 = vmax.f32 %v279_v24, 0.0 }
 0x110   :  { %422 = vmatprep.mubr.f32.mxu0 %v281_v25 }
 0x111   :  { %423 = vmatmul.mubr.f32.vlgmr.msra.gmra.mxu0 %v280_v26 }
 0x1d1   :  { %v424_v31 = vpop.f32.mrf.mxu0 }
 0x1d2   :  { %v425_v32 = vadd.f32 %v424_v31, %v351_v28 }
 0x1d3   :  { %v426_v34 = vpop.f32.mrf.mxu0 }
 0x1d4   :  { %v429_v35 = vmax.f32 %v425_v32, 0.0  ;;  %v427_v36 = vadd.f32 %v426_v34, %v355_v30 }
 0x1d6   :  { %v430_v38 = vmax.f32 %v427_v36, 0.0  ;;  %v443_v39 = vmul.f32 %v436_v33, %v429_v35 }
 0x1d8   :  { %v444_v40 = vmul.f32 %v440_v37, %v430_v38  ;;  %v446_v41 = vsel %vm445_vm3, %v443_v39, 0.0 }
 0x1da   :  { %v447_v42 = vsel %vm445_vm3, %v444_v40, 0.0 }
 0x1db   :  { %v448_v43 = vadd.f32 %v447_v42, %v446_v41 }
 0x1dd   :  { %449 = vadd.xlane.f32.xlu0 %v448_v43 }
 0x266   :  { %v450_v45 = vpop.xlane.xlu0 %449 }
 0x267   :  { %v458_v46 = vadd.f32 %v474_v44, %v450_v45 }
 0x269   :  { %460 = vst.msk [vmem:[%s691_s9] sm:$0x3] %vm459_vm4, %v458_v46 }
 0x26a   :  { %465 = vsyncpa [#allocation4], 1 }
 0x26b   :  { %466 = vsyncpa [#allocation6], 1 }
 0x26c   :  { %467 = vsyncpa [#allocation9], 1 }

</bundles_post_ra>
